<compile_context>
chip_gen: v5e
topology: v5e:2x2
jax: 0.10.0
libtpu: 0.0.40
codegen_flags: <defaults>
</compile_context>

<pallas_src>
import functools
import math

import jax
import jax.numpy as jnp
from jax.experimental import pallas as pl
from jax.experimental.pallas import tpu as pltpu


def _round_up(x, m):
    return ((x + m - 1) // m) * m


def _cdiv(a, b):
    return (a + b - 1) // b


def _device_kind():
    try:
        return jax.devices()[0].device_kind.lower()
    except Exception:
        return ""


def _vmem_capacity_bytes():
    try:
        cap = getattr(pltpu.get_tpu_info(), "vmem_capacity_bytes", None)
        if cap:
            return int(cap)
    except Exception:
        pass
    return (64 if "v7" in _device_kind() else 128) * 1024 * 1024


def _flash_attention_kernel(*refs, scale, mask_mode, kv_len, tk,
                            operand_dtype, exp_dtype):
    """One (batch-tile, q-tile, kv-tile) grid step of flash attention."""
    if mask_mode == "input":
        q_ref, k_ref, v_ref, keep_ref, o_ref, m_sc, l_sc, acc_sc = refs
    else:
        q_ref, k_ref, v_ref, o_ref, m_sc, l_sc, acc_sc = refs

    kv_idx = pl.program_id(2)

    @pl.when(kv_idx == 0)
    def _init():
        m_sc[...] = jnp.full_like(m_sc, -jnp.inf)
        l_sc[...] = jnp.zeros_like(l_sc)
        acc_sc[...] = jnp.zeros_like(acc_sc)

    # Scale the (small) q operand; cast only the MXU operands (f32 accumulate).
    q = (q_ref[...] * scale).astype(operand_dtype)            # (B, TQ, D)
    k = k_ref[...].astype(operand_dtype)                       # (B, TK, D)
    s = jnp.einsum("bqd,bkd->bqk", q, k,
                   preferred_element_type=jnp.float32)         # (B, TQ, TK)

    if mask_mode == "input":
        # masked_fill semantics (matches torch): fill with -1e9 where keep==0.
        s = jnp.where(keep_ref[...] > 0.5, s, -1e9)
    elif mask_mode == "iota":
        # kv tile-padding mask computed in-kernel: no HBM bias stream needed.
        col = jax.lax.broadcasted_iota(jnp.int32, s.shape, 2) + kv_idx * tk
        s = jnp.where(col < kv_len, s, -1e9)

    # Online softmax update; running stats stay f32.
    m_prev = m_sc[...]
    m_new = jnp.maximum(m_prev, jnp.max(s, axis=-1, keepdims=True))
    alpha = jnp.exp(m_prev - m_new)
    p = jnp.exp((s - m_new).astype(exp_dtype))                 # bf16 EUP on v6e/v7x
    l_sc[...] = alpha * l_sc[...] + jnp.sum(p, axis=-1, keepdims=True,
                                            dtype=jnp.float32)
    p_op = p if p.dtype == operand_dtype else p.astype(operand_dtype)
    acc_sc[...] = alpha * acc_sc[...] + jnp.einsum(
        "bqk,bkd->bqd", p_op, v_ref[...].astype(operand_dtype),
        preferred_element_type=jnp.float32)
    m_sc[...] = m_new

    @pl.when(kv_idx == pl.num_programs(2) - 1)
    def _finalize():
        # Exact reciprocal: runs once per output tile, cost negligible.
        inv_l = pl.reciprocal(l_sc[...], approx=False)
        o_ref[...] = (acc_sc[...] * inv_l).astype(o_ref.dtype)


def _pick_tiles(bz, q_len, kv_len, k_dim, v_dim, in_bytes, out_bytes,
                has_mask, budget):
    """Pick (b_tile, tq, tk) against a generation-aware VMEM budget."""
    # q tile: as big as possible — K/V are re-streamed once per q tile.
    n_q = _cdiv(q_len, 512)
    tq = _round_up(_cdiv(q_len, n_q), 8)
    # kv tile: single tile when kv fits, else multiples of 128 (keeps the
    # keep-array BlockSpec last dim legal and padding small).
    if kv_len <= 512:
        tk = _round_up(kv_len, 8)
    else:
        tk = _round_up(_cdiv(kv_len, _cdiv(kv_len, 512)), 128)

    # Batch tile: amortize tiny q tiles; keep >= 2 parallel grid steps so both
    # v7x TensorCores get work; keep batch padding <= ~12.5%.
    n_q_tiles = _round_up(q_len, tq) // tq
    cap = max(1, min(bz, 512 // max(tq, 1)))
    b_tile = 1
    for b in range(cap, 0, -1):
        bz_pad = _round_up(bz, b)
        extent = (bz_pad // b) * n_q_tiles
        if (bz_pad - bz) * 8 <= max(bz, 8) and extent >= min(2, bz * n_q_tiles):
            b_tile = b
            break

    def est(b, tq_, tk_):
        blocks = 2 * b * (tq_ * k_dim + tk_ * k_dim + tk_ * v_dim) * in_bytes
        blocks += 2 * b * tq_ * v_dim * out_bytes
        if has_mask:
            blocks += 2 * b * tk_ * 4
        scratch = b * tq_ * (v_dim + 2) * 4
        temps = 3 * b * tq_ * tk_ * 4          # s / p / mask f32 temporaries
        return blocks + scratch + temps

    while est(b_tile, tq, tk) > budget:
        if tk > 128:
            tk = max(128, _round_up(tk // 2, 128))
        elif tq > 8:
            tq = max(8, _round_up(tq // 2, 8))
        elif b_tile > 1:
            b_tile = max(1, b_tile // 2)
        else:
            break
    return b_tile, tq, tk


def dot_product_attention(q, k, v, mask=None, *, use_bf16_operands=None,
                          use_bf16_exp=None):
    """Pallas equivalent of DotProductAttention.forward (eval mode).

    q: (bz, q_len, k_dim), k: (bz, kv_len, k_dim), v: (bz, kv_len, v_dim),
    mask: optional (bz, kv_len) bool/int; 0/False marks padding.
    use_bf16_operands / use_bf16_exp: None = auto-select per TPU generation.
    Returns (bz, q_len, v_dim) in q's dtype.
    """
    bz, q_len, k_dim = q.shape
    bz_k, kv_len, k_dim_k = k.shape
    bz_v, kv_len_v, v_dim = v.shape
    assert bz == bz_k == bz_v and kv_len == kv_len_v and k_dim == k_dim_k

    out_dtype = q.dtype
    scale = 1.0 / math.sqrt(k_dim)

    kind = _device_kind()
    if use_bf16_operands is None:
        use_bf16_operands = True                      # MXU takes bf16 on all gens
    if use_bf16_exp is None:
        use_bf16_exp = ("v6" in kind) or ("v7" in kind)   # bf16 EUP gens only
    operand_dtype = jnp.bfloat16 if use_bf16_operands else jnp.float32
    exp_dtype = jnp.bfloat16 if use_bf16_exp else jnp.float32

    vmem_cap = _vmem_capacity_bytes()
    vmem_limit = int(vmem_cap * 0.65)       # leave compiler-scratch headroom
    tile_budget = int(vmem_cap * 0.5)

    in_bytes = jnp.dtype(q.dtype).itemsize
    out_bytes = jnp.dtype(out_dtype).itemsize
    b_tile, tq, tk = _pick_tiles(bz, q_len, kv_len, k_dim, v_dim,
                                 in_bytes, out_bytes, mask is not None,
                                 tile_budget)

    bz_p = _round_up(bz, b_tile)
    q_p = _round_up(q_len, tq)
    kv_p = _round_up(kv_len, tk)

    if mask is not None:
        mask_mode = "input"
    elif kv_p != kv_len:
        mask_mode = "iota"                  # padding-only mask, done in-kernel
    else:
        mask_mode = "none"

    # Feature dims stay unpadded; only tile-divisibility padding when needed.
    if bz_p != bz or q_p != q_len:
        q = jnp.pad(q, ((0, bz_p - bz), (0, q_p - q_len), (0, 0)))
    if bz_p != bz or kv_p != kv_len:
        k = jnp.pad(k, ((0, bz_p - bz), (0, kv_p - kv_len), (0, 0)))
        v = jnp.pad(v, ((0, bz_p - bz), (0, kv_p - kv_len), (0, 0)))

    inputs = [q, k, v]
    in_specs = [
        pl.BlockSpec((b_tile, tq, k_dim), lambda b, qi, ki: (b, qi, 0)),
        # TODO(synk): if a profile shows exposed K/V DMA at large tk, add
        #             pipeline_mode=pl.Buffered(3) on the two specs below.
        pl.BlockSpec((b_tile, tk, k_dim), lambda b, qi, ki: (b, ki, 0)),
        pl.BlockSpec((b_tile, tk, v_dim), lambda b, qi, ki: (b, ki, 0)),
    ]
    if mask_mode == "input":
        keep = (mask != 0).astype(jnp.float32)[:, None, :]     # (bz, 1, kv_len)
        if bz_p != bz or kv_p != kv_len:
            keep = jnp.pad(keep, ((0, bz_p - bz), (0, 0), (0, kv_p - kv_len)))
        inputs.append(keep)
        in_specs.append(
            pl.BlockSpec((b_tile, 1, tk), lambda b, qi, ki: (b, 0, ki)))

    kernel = functools.partial(
        _flash_attention_kernel, scale=scale, mask_mode=mask_mode,
        kv_len=kv_len, tk=tk, operand_dtype=operand_dtype, exp_dtype=exp_dtype)

    out = pl.pallas_call(
        kernel,
        out_shape=jax.ShapeDtypeStruct((bz_p, q_p, v_dim), out_dtype),
        grid_spec=pltpu.PrefetchScalarGridSpec(
            num_scalar_prefetch=0,
            grid=(bz_p // b_tile, q_p // tq, kv_p // tk),
            in_specs=in_specs,
            out_specs=pl.BlockSpec((b_tile, tq, v_dim),
                                   lambda b, qi, ki: (b, qi, 0)),
            scratch_shapes=[
                pltpu.VMEM((b_tile, tq, 1), jnp.float32),       # running max
                pltpu.VMEM((b_tile, tq, 1), jnp.float32),       # running denom
                pltpu.VMEM((b_tile, tq, v_dim), jnp.float32),   # weighted-V acc
            ]),
        compiler_params=pltpu.CompilerParams(
            dimension_semantics=("parallel", "parallel", "arbitrary"),
            vmem_limit_bytes=vmem_limit),
    )(*inputs)

    if bz_p != bz or q_p != q_len:
        out = out[:bz, :q_len, :]
    return out


def _reference(q, k, v, mask):
    scale = 1.0 / math.sqrt(q.shape[-1])
    s = jnp.einsum("bqd,bkd->bqk", q, k) * scale
    if mask is not None:
        s = jnp.where(mask[:, None, :] != 0, s, -1e9)
    w = jax.nn.softmax(s, axis=-1)
    return jnp.einsum("bqk,bkd->bqd", w, v)


if __name__ == "__main__":
    key = jax.random.PRNGKey(0)
    kq, kk, kv_ = jax.random.split(key, 3)

    # --- Test 1: masked, tiny module-scale shapes, default (auto-bf16) path --
    bz, q_len, kv_len, k_dim, v_dim = 2, 8, 8, 32, 32
    q = jax.random.normal(kq, (bz, q_len, k_dim), dtype=jnp.float32)
    k = jax.random.normal(kk, (bz, kv_len, k_dim), dtype=jnp.float32)
    v = jax.random.normal(kv_, (bz, kv_len, v_dim), dtype=jnp.float32)
    mask = jnp.ones((bz, kv_len), dtype=jnp.int32).at[1, -2:].set(0)

    ref = _reference(q, k, v, mask)
    out = jax.block_until_ready(dot_product_attention(q, k, v, mask))
    assert out.shape == (bz, q_len, v_dim)
    assert out.dtype == jnp.float32
    assert jnp.allclose(out, ref, atol=1e-1, rtol=1e-1), (
        float(jnp.max(jnp.abs(out - ref))))

    # --- Test 2: same inputs, full-f32 path -> tight parity -----------------
    out2 = jax.block_until_ready(dot_product_attention(
        q, k, v, mask, use_bf16_operands=False, use_bf16_exp=False))
    assert jnp.allclose(out2, ref, atol=1e-4, rtol=1e-4), (
        float(jnp.max(jnp.abs(out2 - ref))))

    # --- Test 3: no mask, long kv (multi kv-tile online softmax + in-kernel
    #             kv-padding mask) and uneven batch (batch-tile padding) ------
    bz3, q3, kv3 = 3, 16, 600
    q_b = jax.random.normal(kq, (bz3, q3, k_dim), dtype=jnp.float32)
    k_b = jax.random.normal(kk, (bz3, kv3, k_dim), dtype=jnp.float32)
    v_b = jax.random.normal(kv_, (bz3, kv3, v_dim), dtype=jnp.float32)
    ref3 = _reference(q_b, k_b, v_b, None)
    out3 = jax.block_until_ready(dot_product_attention(
        q_b, k_b, v_b, None, use_bf16_operands=False, use_bf16_exp=False))
    assert out3.shape == (bz3, q3, v_dim)
    assert jnp.allclose(out3, ref3, atol=1e-4, rtol=1e-4), (
        float(jnp.max(jnp.abs(out3 - ref3))))

    # --- Test 4: same long-kv shape on the default (bf16 MXU/EUP) path ------
    out4 = jax.block_until_ready(dot_product_attention(q_b, k_b, v_b, None))
    assert jnp.allclose(out4, ref3, atol=1e-1, rtol=1e-1), (
        float(jnp.max(jnp.abs(out4 - ref3))))

    print("KERNEL_OK")
</pallas_src>

<mosaic_0001>
module attributes {stable_mosaic.version = 11 : i64} {
  func.func @_flash_attention_kernel(%arg0: i32, %arg1: i32, %arg2: i32, %arg3: memref<1x8x32xf32, #tpu.memory_space<vmem>>, %arg4: memref<1x8x32xf32, #tpu.memory_space<vmem>>, %arg5: memref<1x8x32xf32, #tpu.memory_space<vmem>>, %arg6: memref<1x1x8xf32, #tpu.memory_space<vmem>>, %arg7: memref<1x8x32xf32, #tpu.memory_space<vmem>>, %arg8: memref<1x8x1xf32, #tpu.memory_space<vmem>>, %arg9: memref<1x8x1xf32, #tpu.memory_space<vmem>>, %arg10: memref<1x8x32xf32, #tpu.memory_space<vmem>>) attributes {dimension_semantics = [#tpu.dimension_semantics<parallel>, #tpu.dimension_semantics<parallel>, #tpu.dimension_semantics<arbitrary>], iteration_bounds = array<i64: 2, 1, 1>, scalar_prefetch = 0 : i64, scratch_operands = 3 : i64, tpu.core_type = #tpu.core_type<tc>, window_params = [{transform_indices = @transform_0, window_bounds = array<i64: 1, 8, 32>}, {transform_indices = @transform_1, window_bounds = array<i64: 1, 8, 32>}, {transform_indices = @transform_2, window_bounds = array<i64: 1, 8, 32>}, {transform_indices = @transform_3, window_bounds = array<i64: 1, 1, 8>}, {transform_indices = @transform_4, window_bounds = array<i64: 1, 8, 32>}]} {
    %c0_i32 = arith.constant 0 : i32
    %0 = arith.cmpi eq, %arg2, %c0_i32 : i32
    %1 = arith.extui %0 : i1 to i32
    %c0_i32_0 = arith.constant 0 : i32
    %2 = arith.cmpi ne, %1, %c0_i32_0 : i32
    scf.if %2 {
      %cst_38 = arith.constant 0xFF800000 : f32
      %45 = vector.broadcast %cst_38 : f32 to vector<1x8x1xf32>
      %c0_39 = arith.constant 0 : index
      %c0_40 = arith.constant 0 : index
      %c0_41 = arith.constant 0 : index
      %46 = vector.load %arg8[%c0_39, %c0_40, %c0_41] : memref<1x8x1xf32, #tpu.memory_space<vmem>>, vector<1x8x1xf32>
      tpu.vector_store %arg8[%c0_39, %c0_40, %c0_41], %45 {strides = array<i32>} : memref<1x8x1xf32, #tpu.memory_space<vmem>>, vector<1x8x1xf32>,
      %cst_42 = arith.constant 0.000000e+00 : f32
      %47 = vector.broadcast %cst_42 : f32 to vector<1x8x1xf32>
      %c0_43 = arith.constant 0 : index
      %c0_44 = arith.constant 0 : index
      %c0_45 = arith.constant 0 : index
      %48 = vector.load %arg9[%c0_43, %c0_44, %c0_45] : memref<1x8x1xf32, #tpu.memory_space<vmem>>, vector<1x8x1xf32>
      tpu.vector_store %arg9[%c0_43, %c0_44, %c0_45], %47 {strides = array<i32>} : memref<1x8x1xf32, #tpu.memory_space<vmem>>, vector<1x8x1xf32>,
      %cst_46 = arith.constant 0.000000e+00 : f32
      %49 = vector.broadcast %cst_46 : f32 to vector<1x8x32xf32>
      %c0_47 = arith.constant 0 : index
      %c0_48 = arith.constant 0 : index
      %c0_49 = arith.constant 0 : index
      %50 = vector.load %arg10[%c0_47, %c0_48, %c0_49] : memref<1x8x32xf32, #tpu.memory_space<vmem>>, vector<1x8x32xf32>
      tpu.vector_store %arg10[%c0_47, %c0_48, %c0_49], %49 {strides = array<i32>} : memref<1x8x32xf32, #tpu.memory_space<vmem>>, vector<1x8x32xf32>,
    } else {
    }
    %c0 = arith.constant 0 : index
    %c0_1 = arith.constant 0 : index
    %c0_2 = arith.constant 0 : index
    %3 = vector.load %arg3[%c0, %c0_1, %c0_2] : memref<1x8x32xf32, #tpu.memory_space<vmem>>, vector<1x8x32xf32>
    %cst = arith.constant 0.176776692 : f32
    %4 = vector.broadcast %cst : f32 to vector<1x8x32xf32>
    %5 = arith.mulf %3, %4 : vector<1x8x32xf32>
    %6 = arith.truncf %5 : vector<1x8x32xf32> to vector<1x8x32xbf16>
    %c0_3 = arith.constant 0 : index
    %c0_4 = arith.constant 0 : index
    %c0_5 = arith.constant 0 : index
    %7 = vector.load %arg4[%c0_3, %c0_4, %c0_5] : memref<1x8x32xf32, #tpu.memory_space<vmem>>, vector<1x8x32xf32>
    %8 = arith.truncf %7 : vector<1x8x32xf32> to vector<1x8x32xbf16>
    "tpu.trace_start"() <{level = 10 : i32, message = "bqd,bkd->bqk"}> : () -> ()
    %cst_6 = arith.constant dense<0.000000e+00> : vector<1x8x8xf32>
    %9 = tpu.matmul %6, %8, %cst_6 {dimension_numbers = #tpu.dot_dimension_numbers<[2], [2], [1], [1], [0, 0, 0, 1, 1, 1], [0], [0]>} : vector<1x8x32xbf16>, vector<1x8x32xbf16>, vector<1x8x8xf32> -> vector<1x8x8xf32>
    "tpu.trace_stop"() : () -> ()
    %c0_7 = arith.constant 0 : index
    %c0_8 = arith.constant 0 : index
    %c0_9 = arith.constant 0 : index
    %10 = vector.load %arg6[%c0_7, %c0_8, %c0_9] : memref<1x1x8xf32, #tpu.memory_space<vmem>>, vector<1x1x8xf32>
    %cst_10 = arith.constant 5.000000e-01 : f32
    %11 = vector.broadcast %cst_10 : f32 to vector<1x1x8xf32>
    %12 = arith.cmpf ogt, %10, %11 : vector<1x1x8xf32>
    %cst_11 = arith.constant -1.000000e+09 : f32
    %13 = vector.shape_cast %12 : vector<1x1x8xi1> to vector<1x1x8xi1>
    %14 = vector.broadcast %13 : vector<1x1x8xi1> to vector<1x8x8xi1>
    %15 = vector.broadcast %cst_11 : f32 to vector<1x8x8xf32>
    %16 = arith.select %14, %9, %15 : vector<1x8x8xi1>, vector<1x8x8xf32>
    %c0_12 = arith.constant 0 : index
    %c0_13 = arith.constant 0 : index
    %c0_14 = arith.constant 0 : index
    %17 = vector.load %arg8[%c0_12, %c0_13, %c0_14] : memref<1x8x1xf32, #tpu.memory_space<vmem>>, vector<1x8x1xf32>
    %cst_15 = arith.constant dense<0xFF800000> : vector<1x8xf32>
    %18 = vector.multi_reduction <maximumf>, %16, %cst_15 [2] : vector<1x8x8xf32> to vector<1x8xf32>
    %19 = vector.shape_cast %18 : vector<1x8xf32> to vector<1x8x1xf32>
    %20 = arith.maximumf %17, %19 : vector<1x8x1xf32>
    %21 = arith.subf %17, %20 : vector<1x8x1xf32>
    %22 = math.exp %21 : vector<1x8x1xf32>
    %23 = vector.broadcast %20 : vector<1x8x1xf32> to vector<1x8x8xf32>
    %24 = arith.subf %16, %23 : vector<1x8x8xf32>
    %25 = math.exp %24 : vector<1x8x8xf32>
    %c0_16 = arith.constant 0 : index
    %c0_17 = arith.constant 0 : index
    %c0_18 = arith.constant 0 : index
    %26 = vector.load %arg9[%c0_16, %c0_17, %c0_18] : memref<1x8x1xf32, #tpu.memory_space<vmem>>, vector<1x8x1xf32>
    %27 = arith.mulf %22, %26 : vector<1x8x1xf32>
    %cst_19 = arith.constant dense<0.000000e+00> : vector<1x8xf32>
    %28 = vector.multi_reduction <add>, %25, %cst_19 [2] : vector<1x8x8xf32> to vector<1x8xf32>
    %29 = vector.shape_cast %28 : vector<1x8xf32> to vector<1x8x1xf32>
    %30 = arith.addf %27, %29 : vector<1x8x1xf32>
    %c0_20 = arith.constant 0 : index
    %c0_21 = arith.constant 0 : index
    %c0_22 = arith.constant 0 : index
    %31 = vector.load %arg9[%c0_20, %c0_21, %c0_22] : memref<1x8x1xf32, #tpu.memory_space<vmem>>, vector<1x8x1xf32>
    tpu.vector_store %arg9[%c0_20, %c0_21, %c0_22], %30 {strides = array<i32>} : memref<1x8x1xf32, #tpu.memory_space<vmem>>, vector<1x8x1xf32>,
    %32 = arith.truncf %25 : vector<1x8x8xf32> to vector<1x8x8xbf16>
    %c0_23 = arith.constant 0 : index
    %c0_24 = arith.constant 0 : index
    %c0_25 = arith.constant 0 : index
    %33 = vector.load %arg10[%c0_23, %c0_24, %c0_25] : memref<1x8x32xf32, #tpu.memory_space<vmem>>, vector<1x8x32xf32>
    %34 = vector.broadcast %22 : vector<1x8x1xf32> to vector<1x8x32xf32>
    %35 = arith.mulf %34, %33 : vector<1x8x32xf32>
    %c0_26 = arith.constant 0 : index
    %c0_27 = arith.constant 0 : index
    %c0_28 = arith.constant 0 : index
    %36 = vector.load %arg5[%c0_26, %c0_27, %c0_28] : memref<1x8x32xf32, #tpu.memory_space<vmem>>, vector<1x8x32xf32>
    %37 = arith.truncf %36 : vector<1x8x32xf32> to vector<1x8x32xbf16>
    "tpu.trace_start"() <{level = 10 : i32, message = "bqk,bkd->bqd"}> : () -> ()
    %cst_29 = arith.constant dense<0.000000e+00> : vector<1x8x32xf32>
    %38 = tpu.matmul %32, %37, %cst_29 {dimension_numbers = #tpu.dot_dimension_numbers<[2], [1], [1], [2], [0, 0, 0, 1, 1, 2], [0], [0]>} : vector<1x8x8xbf16>, vector<1x8x32xbf16>, vector<1x8x32xf32> -> vector<1x8x32xf32>
    "tpu.trace_stop"() : () -> ()
    %39 = arith.addf %35, %38 : vector<1x8x32xf32>
    %c0_30 = arith.constant 0 : index
    %c0_31 = arith.constant 0 : index
    %c0_32 = arith.constant 0 : index
    %40 = vector.load %arg10[%c0_30, %c0_31, %c0_32] : memref<1x8x32xf32, #tpu.memory_space<vmem>>, vector<1x8x32xf32>
    tpu.vector_store %arg10[%c0_30, %c0_31, %c0_32], %39 {strides = array<i32>} : memref<1x8x32xf32, #tpu.memory_space<vmem>>, vector<1x8x32xf32>,
    %c0_33 = arith.constant 0 : index
    %c0_34 = arith.constant 0 : index
    %c0_35 = arith.constant 0 : index
    %41 = vector.load %arg8[%c0_33, %c0_34, %c0_35] : memref<1x8x1xf32, #tpu.memory_space<vmem>>, vector<1x8x1xf32>
    tpu.vector_store %arg8[%c0_33, %c0_34, %c0_35], %20 {strides = array<i32>} : memref<1x8x1xf32, #tpu.memory_space<vmem>>, vector<1x8x1xf32>,
    %c0_i32_36 = arith.constant 0 : i32
    %42 = arith.cmpi eq, %arg2, %c0_i32_36 : i32
    %43 = arith.extui %42 : i1 to i32
    %c0_i32_37 = arith.constant 0 : i32
    %44 = arith.cmpi ne, %43, %c0_i32_37 : i32
    scf.if %44 {
      %c0_38 = arith.constant 0 : index
      %c0_39 = arith.constant 0 : index
      %c0_40 = arith.constant 0 : index
      %45 = vector.load %arg9[%c0_38, %c0_39, %c0_40] : memref<1x8x1xf32, #tpu.memory_space<vmem>>, vector<1x8x1xf32>
      %46 = tpu.reciprocal %45 : vector<1x8x1xf32> -> vector<1x8x1xf32>
      %c0_41 = arith.constant 0 : index
      %c0_42 = arith.constant 0 : index
      %c0_43 = arith.constant 0 : index
      %47 = vector.load %arg10[%c0_41, %c0_42, %c0_43] : memref<1x8x32xf32, #tpu.memory_space<vmem>>, vector<1x8x32xf32>
      %48 = vector.broadcast %46 : vector<1x8x1xf32> to vector<1x8x32xf32>
      %49 = arith.mulf %47, %48 : vector<1x8x32xf32>
      %c0_44 = arith.constant 0 : index
      %c0_45 = arith.constant 0 : index
      %c0_46 = arith.constant 0 : index
      %50 = vector.load %arg7[%c0_44, %c0_45, %c0_46] : memref<1x8x32xf32, #tpu.memory_space<vmem>>, vector<1x8x32xf32>
      tpu.vector_store %arg7[%c0_44, %c0_45, %c0_46], %49 {strides = array<i32>} : memref<1x8x32xf32, #tpu.memory_space<vmem>>, vector<1x8x32xf32>,
    } else {
    }
    return
  }
  func.func @transform_0(%arg0: i32, %arg1: i32, %arg2: i32) -> (i32, i32, i32) {
    %c0_i32 = arith.constant 0 : i32
    %c0_i32_0 = arith.constant 0 : i32
    return %arg0, %arg1, %c0_i32 : i32, i32, i32
  }
  func.func @transform_1(%arg0: i32, %arg1: i32, %arg2: i32) -> (i32, i32, i32) {
    %c0_i32 = arith.constant 0 : i32
    %c0_i32_0 = arith.constant 0 : i32
    return %arg0, %arg2, %c0_i32 : i32, i32, i32
  }
  func.func @transform_2(%arg0: i32, %arg1: i32, %arg2: i32) -> (i32, i32, i32) {
    %c0_i32 = arith.constant 0 : i32
    %c0_i32_0 = arith.constant 0 : i32
    return %arg0, %arg2, %c0_i32 : i32, i32, i32
  }
  func.func @transform_3(%arg0: i32, %arg1: i32, %arg2: i32) -> (i32, i32, i32) {
    %c0_i32 = arith.constant 0 : i32
    %c0_i32_0 = arith.constant 0 : i32
    return %arg0, %c0_i32, %arg2 : i32, i32, i32
  }
  func.func @transform_4(%arg0: i32, %arg1: i32, %arg2: i32) -> (i32, i32, i32) {
    %c0_i32 = arith.constant 0 : i32
    %c0_i32_0 = arith.constant 0 : i32
    return %arg0, %arg1, %c0_i32 : i32, i32, i32
  }
}

</mosaic_0001>

<bundles_post_ra>
// kernel: tpu_custom_call.1
= control target key start
LH: loop header
LB: loop body
LE: loop exit
PB: predicated region body
PF: predicated region fallthrough
CT: control target
= control target key end

     0   :  { %s1113_s0 = inlined_call_operand.hbm [shape: f32[2,8,32], index: 0, kind: input, shape index: {}]   ;;  %s1114_s1 = inlined_call_operand.hbm [shape: f32[2,8,32], index: 1, kind: input, shape index: {}]   ;;  %s1115_s2 = inlined_call_operand.hbm [shape: f32[2,8,32], index: 2, kind: input, shape index: {}]   ;;  %s1116_s3 = inlined_call_operand.vmem [shape: f32[2,1,8], index: 3, kind: input, shape index: {}]   ;;  %s1117_s4 = inlined_call_operand.hbm [shape: f32[2,8,32], index: 4, kind: output, shape index: {}]  }
   0x1   :  { %1121 = sst [smem:[#allocation19_spill]] %s1114_s1 }
   0x2   :  { %9 = vsyncpa [#allocation6], 0 }
   0x3   :  { %11 = vsyncpa [#allocation6 + $0x1], 0 }
   0x4   :  { %12 = vsyncpa [#allocation9], 0 }
   0x5   :  { %14 = vsyncpa [#allocation9 + $0x1], 0 }
   0x6   :  { %15 = vsyncpa [#allocation7], 0 }
   0x7   :  { %17 = vsyncpa [#allocation7 + $0x1], 0  ;;  %s938_s15 = smov 0   ;;  %s940_s16 = smov 0  }
   0x8   :  { %s942_s17 = smov 0   ;;  %s944_s18 = smov 0  }
   0x9   :  { %s946_s19 = smov 0   ;;  %s948_s20 = smov 0  }
   0xa LB: > { %1122 = sst [smem:[#allocation15_spill]] %s896_s17  ;;  %s969_s21 = sadd.s32 4294967295, %s908_s20   ;;  %s908_s20 = sphi %s948_s20, %s23_s20   ;;  %s904_s19 = sphi %s946_s19, %s1136_s19   ;;  %s900_s18 = sphi %s944_s18, %s1135_s18   ;;  %s896_s17 = sphi %s942_s17, %s1134_s17   ;;  %s892_s16 = sphi %s940_s16, %s1138_s16   ;;  %s888_s15 = sphi %s938_s15, %s1137_s15  }
   0xb   : > { %1123 = sst [smem:[#allocation16_spill]] %s904_s19  ;;  %s628_s22 = sadd.s32 4294967294, %s908_s20  }
   0xc   : > { %s42_s23 = sadd.s32 1, %s904_s19  ;;  %s51_s24 = sadd.s32 1, %s896_s17 }
   0xd   : > { %p44_p0 = scmp.ge.s32.totalorder %s42_s23, 2  ;;  %p58_p1 = scmp.ne.s32.totalorder %s896_s17, %s892_s16 }
   0xe   : > { %p59_p2 = scmp.eq.s32.totalorder %s908_s20, 0  ;;  %p64_p3 = scmp.ne.s32.totalorder %s892_s16, %s888_s15 }
   0xf   : > { %s1140_s23 = smov (%p44_p0, %s42_s23), 0  ;;  %p65_p5 = scmp.eq.s32.totalorder %s969_s21, 0 }
  0x10   : > { %1124 = sst [smem:[#allocation17_spill]] %s1140_s23  ;;  %p981_p4 = por %p59_p2, %p58_p1 }
  0x11   : > { %s46_s26 = ssub.s32 %s904_s19, %s1140_s23  ;;  %p174_p6 = scmp.eq.s32.totalorder %s969_s21, 1 }
  0x12   : > { %p49_p7 = scmp.eq.s32.totalorder %s46_s26, 0  ;;  %p989_p8 = por %p65_p5, %p64_p3 }
  0x13   : > { %p993_p9 = por %p174_p6, %p58_p1  ;;  %p180_p10 = scmp.eq.s32.totalorder %s628_s22, 1 }
  0x14   : > { %s998_s29 = scalar_select %p49_p7, %s896_s17, %s51_s24  }
  0x15   : > { %p1000_p11 = por %p180_p10, %p64_p3  ;;  %p630_p12 = scmp.ge.s32.totalorder %s908_s20, 2 }
  0x16   : > { %1128 = sst [smem:[#allocation18_spill]] %s998_s29  ;;  %p670_p13 = scmp.lt.s32.totalorder %s908_s20, 2 }
  0x17   : > { %s200_s5 = sand.u32 1, %s896_s17   ;;  %s632_s7 = sshll.u32 %s904_s19, 3 }
  0x18   : > { %s631_s6 = sshll.u32 %s200_s5, 3  ;;  %p1010_p0 = pnand %p670_p13, %p981_p4 }
  0x19   : > { %s220_s9 = sand.u32 1, %s908_s20   ;;  %s1131_s1 = sld [smem:[#allocation19_spill]] }
  0x1a   : > { %s224_s14 = scalar_lea.vmem [#allocation8], %s631_s6  ;;  %s221_s24 = scalar_lea.sflag [#allocation9], %s220_s9 }
  0x1b   : > { %s233_s22 = sshll.u32 %s224_s14, 4  ;;  %p637_p1 = scmp.ge.s32.totalorder %s908_s20, 1  ;;  %s234_s22 = int_to_ptr.vmem [resolvable:$true] %s233_s22 }
  0x1c   : > { %p267_p2 = scmp.lt.s32.totalorder %s908_s20, 3  ;;  %s209_s10 = scalar_lea.hbm %s1113_s0, %s632_s7 }
  0x1d   : > { %s211_s11 = sshll.u32 %s209_s10, 4  ;;  %s201_s14 = scalar_lea.sflag [#allocation6], %s200_s5  ;;  %s212_s11 = int_to_ptr.hbm [resolvable:$true] %s211_s11 }
  0x1e   : > { %p1022_p3 = pnand %p637_p1, %p267_p2  ;;  %s244_s29 = scalar_lea.vmem [#allocation10], %s631_s6 }
  0x1f   : > { %s229_s12 = scalar_lea.hbm %s1131_s1, %s632_s7  ;;  %s253_s17 = sshll.u32 %s244_s29, 4  ;;  %s254_s17 = int_to_ptr.vmem [resolvable:$true] %s253_s17 }
  0x20   : > { %s231_s13 = sshll.u32 %s229_s12, 4  ;;  %s204_s12 = scalar_lea.vmem [#allocation5], %s631_s6  ;;  %s232_s13 = int_to_ptr.hbm [resolvable:$true] %s231_s13 }
  0x21   : > { %662 = dma.hbm_to_vmem [thread:$0]  (!%p1010_p0), %s232_s13, 128, %s234_s22, %s221_s24  }
  0x22   : > { %s213_s1 = sshll.u32 %s204_s12, 4  ;;  %s249_s22 = scalar_lea.hbm %s1115_s2, %s632_s7  ;;  %s214_s1 = int_to_ptr.vmem [resolvable:$true] %s213_s1 }
  0x23   : > { %659 = dma.hbm_to_vmem [thread:$0]  (!%p1010_p0), %s212_s11, 128, %s214_s1, %s201_s14  }
  0x24   : > { %s251_s19 = sshll.u32 %s249_s22, 4  ;;  %271 = sbr.rel (%p1022_p3) target bundleno = 668 (0x29c), region = 36  ;;  %s252_s19 = int_to_ptr.hbm [resolvable:$true] %s251_s19 }
  0x25   : > { %665 = dma.hbm_to_vmem [thread:$0]  (!%p1010_p0), %s252_s19, 128, %s254_s17, %s221_s24  }
  0x26   : > { %s1039_s23 = sand.u32 (!%p1022_p3), 1, %s892_s16  }
  0x27   : > { %s1042_s1 = sshll.u32 (!%p1022_p3), %s1039_s23, 3  ;;  %s274_s5 = scalar_lea.sflag (!%p1022_p3), [#allocation6], %s1039_s23 }
  0x28   : > { %s277_s7 = scalar_lea.vmem (!%p1022_p3), [#allocation5], %s1042_s1 }
  0x29   : > { %875 = dma.done.wait (%p989_p8), %s274_s5, 128  }
  0x2a   : > { %877 = vsyncadd (%p989_p8), %s274_s5, 4294967168  ;;  %s283_s17 = sand.u32 1, %s969_s21   ;;  %s287_s29 = scalar_lea.vmem [#allocation8], %s1042_s1 }
  0x2b   : > { %s284_s19 = scalar_lea.sflag [#allocation9], %s283_s17 }
  0x2c   : > { %879 = dma.done.wait (%p989_p8), %s284_s19, 256  }
  0x2d   : > { %881 = vsyncadd (%p989_p8), %s284_s19, 4294967040  ;;  %vm353_vm0 = vcmask 261120   ;;  %v910_v0 = vmov 0.0   ;;  %v358_v1 = vld [vmem:[%s287_s29] sm:$0xff]  ;;  %v355_v2 = vld [vmem:[%s277_s7] sm:$0xff]  ;;  %v911_v7 = vmov 0  }
  0x2e   : > { %354 = vst.msk [vmem:[#allocation4] sm:$0xff] %vm353_vm0, %v910_v0  ;;  %v359_v3 = vpack.c.bf16 %v358_v1, %v358_v1  ;;  %v356_v5 = vmul.f32 0.17677669, %v355_v2  ;;  %723 = vset.pattern.permute.xlu0 %v911_v7  ;;  %724 = vset.pattern.permute.xlu1 %v911_v7  ;;  %p339_p4 = scmp.lt.s32.totalorder %s900_s18, 1  ;;  %vm350_vm1 = vcmask 7168   ;;  %v912_v8 = vmov -inf  }
  0x2f   : > { %725 = vset.pattern.permute.xlu2 %v911_v7  ;;  %351 = vst.msk [vmem:[#allocation2] sm:$0xff] %vm350_vm1, %v912_v8  ;;  %vm387_vm4 = vcmask 64512   ;;  %s297_s24 = scalar_lea.vmem [#allocation10], %s1042_s1  ;;  %vm424_vm5 = vcmask 1043456   ;;  %s645_s25 = sshll.u32 %s900_s18, 3 }
  0x30   : > { %v365_v4 = vsel %vm353_vm0, %v359_v3, 0  ;;  %v357_v6 = vpack.c.bf16 %v356_v5, %v356_v5  ;;  %s340_s21 = scalar_select %p339_p4, %s900_s18, 1  ;;  %352 = vst.msk [vmem:[#allocation3] sm:$0xff] %vm350_vm1, %v910_v0  ;;  %v419_v20 = vld [vmem:[%s297_s24] sm:$0xff] }
  0x31   : > { %374 = vmatpush.bf16.xpose.msra.mxu0 %v365_v4  ;;  %v420_v21 = vpack.c.bf16 %v419_v20, %v419_v20  ;;  %s482_s11 = scalar_lea.hbm %s1117_s4, %s645_s25  ;;  %s338_s12 = scalar_lea.vmem [#allocation11], %s1042_s1 }
  0x32   : > { %s344_s8 = scalar_lea.vmem %s1116_s3, %s340_s21  ;;  %s484_s14 = sshll.u32 %s338_s12, 4  ;;  %s485_s14 = int_to_ptr.vmem [resolvable:$true] %s484_s14 }
  0x33   : > { %v380_v9 = vld [vmem:[%s344_s8] sm:$0x1]  ;;  %v426_v22 = vsel %vm424_vm5, %v420_v21, 0  ;;  %s486_s9 = sshll.u32 %s482_s11, 4  ;;  %s471_s13 = scalar_lea.sflag [#allocation7], %s1039_s23  ;;  %s487_s9 = int_to_ptr.hbm [resolvable:$true] %s486_s9 }
  0x34   : > { %vm381_vm2 = vcmp.gt.f32.partialorder %v380_v9, 0.5  ;;  %435 = vmatpush.bf16.msra.mxu1 %v426_v22  ;;  %s836_s22 = sshra.s32 %s487_s9, 4  ;;  %s842_s1 = scalar_lea.hbm %s1117_s4, 16  ;;  %s837_s22 = int_to_ptr.hbm [resolvable:$true] %s836_s22 }
  0x35   : > { %v382_v10 = vsel %vm381_vm2, 1, %v911_v7  ;;  %v412_v42 = vld [vmem:[#allocation4] sm:$0xff]  ;;  %s838_s5 = scalar_lea.hbm %s837_s22, 8  ;;  %p843_p8 = scmp.lt.s32.totalorder %s837_s22, %s1117_s4 }
  0x36   : > { %v383_v11 = vperm.slane %v382_v10, 0  ;;  %v386_v16 = vld [vmem:[#allocation2] sm:$0xff]  ;;  %p839_p5 = scmp.ne.s32.totalorder %s837_s22, %s838_s5  ;;  %p844_p10 = scmp.lt.s32.totalorder %s842_s1, %s838_s5 }
  0x37   : > { %v403_v31 = vld [vmem:[#allocation3] sm:$0xff] }
  0x38   : > { %642 = vmatmul.msk.bf16.vlgmr.msra.gmra.mxu0 %vm353_vm0, %v357_v6  ;;  %vm384_vm3 = vcmp.eq.s32.totalorder %v383_v11, 1  ;;  %p840_p6 = pnand %p839_p5, %p993_p9  ;;  %p845_p13 = por %p844_p10, %p843_p8 }
  0x3a   : > { %p841_p7 = pneg %p840_p6 }
  0x3c   : > { %p846_p0 = pnand %p845_p13, %p841_p7 }
  0xb5   : > { %v376_v12 = vpop.f32.mrf.mxu0 }
  0xb6   : > { %v385_v13 = vsel %vm384_vm3, %v376_v12, -1e+09 }
  0xb7   : > { %v388_v14 = vsel %vm387_vm4, %v385_v13, -inf }
  0xb8   : > { %389 = vmax.xlane.f32.xlu0 %v388_v14 }
  0xbd   : > { %v378_v15 = vpop.f32.mrf.mxu0 }
 0x12b   : > { %v390_v17 = vpop.xlane.xlu0 %389 }
 0x12c   : > { %v391_v18 = vmax.f32 %v386_v16, %v390_v17 }
 0x12e   : > { %v392_v19 = vsub.f32 %v386_v16, %v391_v18  ;;  %443 = vst.msk [vmem:[#allocation2] sm:$0xff] %vm350_vm1, %v391_v18  ;;  %397 = vperm.xlu0 %723, %v391_v18  }
 0x130   : > { %v393_v29 = vmul.f32 1.442695, %v392_v19 }
 0x1a0   : > { %v398_v23 = vpop.permute.xlu0 %397 }
 0x1a1   : > { %v400_v24 = vsub.f32 %v385_v13, %v398_v23 }
 0x1a3   : > { %v401_v25 = vmul.f32 1.442695, %v400_v24 }
 0x1a5   : > { %726 = vpow2.f32 %v401_v25 }
 0x1a6   : > { %728 = vpow2.f32 %v393_v29 }
 0x1ab   : > { %v727_v26 = vpop.eup %726 }
 0x1ac   : > { %v405_v27 = vsel %vm387_vm4, %v727_v26, 0.0  ;;  %v411_v28 = vpack.c.bf16 %v727_v26, %v727_v26  ;;  %v729_v30 = vpop.eup %728 }
 0x1ad   : > { %406 = vadd.xlane.f32.xlu1 %v405_v27  ;;  %v404_v32 = vmul.f32 %v729_v30, %v403_v31 }
 0x1ae   : > { %643 = vmatmul.msk.bf16.vlgmr.msra.gmra.mxu1 %vm387_vm4, %v411_v28 }
 0x1c6   : > { %415 = vperm.xlu1 %724, %v729_v30  }
 0x220   : > { %v407_v33 = vpop.xlane.xlu1 %406 }
 0x221   : > { %v408_v34 = vadd.f32 %v407_v33, %v404_v32 }
 0x223   : > { %410 = vst.msk [vmem:[#allocation3] sm:$0xff] %vm350_vm1, %v408_v34 }
 0x22a   : > { %v447_v35 = vld [vmem:[#allocation3] sm:$0xff] }
 0x22b   : > { %v437_v36 = vpop.f32.mrf.mxu1  ;;  %730 = vrcp.f32 %v447_v35  ;;  %v459_v41 = vand.u32 2147483648, %v447_v35  ;;  %v457_v44 = vand.u32 2147483647, %v447_v35  ;;  %vm453_vm7 = vweird.f32 %v447_v35 }
 0x22d   : > { %v460_v48 = vor.u32 1.1754944e-38, %v459_v41  ;;  %vm458_vm9 = vcmp.eq.f32.partialorder %v457_v44, 8.507059e+37 }
 0x231   : > { %v731_v37 = vpop.eup %730 }
 0x232   : > { %v449_v38 = vmul.f32 %v731_v37, %v447_v35  ;;  %vm454_vm6 = vweird.f32 %v731_v37 }
 0x233   : > { %v439_v39 = vpop.f32.mrf.mxu1  ;;  %vm455_vm8 = vmor %vm453_vm7, %vm454_vm6 }
 0x234   : > { %v450_v40 = vsub.f32 1.0, %v449_v38 }
 0x236   : > { %v451_v43 = vmul.f32 %v731_v37, %v450_v40 }
 0x238   : > { %v416_v45 = vpop.permute.xlu1 %415  ;;  %v452_v46 = vadd.f32 %v731_v37, %v451_v43 }
 0x239   : > { %v418_v47 = vmul.f32 %v416_v45, %v412_v42 }
 0x23a   : > { %v456_v49 = vsel %vm455_vm8, %v731_v37, %v452_v46 }
 0x23b   : > { %v441_v50 = vadd.f32 %v437_v36, %v418_v47  ;;  %v461_v51 = vsel %vm458_vm9, %v460_v48, %v456_v49 }
 0x23c   : > { %465 = vperm.xlu2 %725, %v461_v51  }
 0x23d   : > { %442 = vst.msk [vmem:[#allocation4] sm:$0xff] %vm353_vm0, %v441_v50 }
 0x244   : > { %v462_v52 = vld [vmem:[#allocation4] sm:$0xff] }
 0x296   : > { %v466_v53 = vpop.permute.xlu2 %465 }
 0x297   : > { %v468_v54 = vmul.f32 %v466_v53, %v462_v52 }
 0x299   : > { %469 = vst.msk [vmem:[%s338_s12] sm:$0xff] %vm353_vm0, %v468_v54 }
 0x29a   : > { %849 = shalt.err (!%p846_p0)
}
 0x29b   : > { %654 = dma.vmem_to_hbm [thread:$0]  (%p993_p9), %s485_s14, 128, %s487_s9, %s471_s13  }
 0x29c PF: > { %s498_s23 = sand.u32 1, %s888_s15   ;;  %p667_p1 = pnand %p630_p12, %p1000_p11 }
 0x29d   : > { %s499_s29 = scalar_lea.sflag [#allocation7], %s498_s23 }
 0x29e   : > { %p668_p2 = pneg %p667_p1 }
 0x2a0   : > { %883 = dma.done.wait (%p668_p2), %s499_s29, 128  }
 0x2a1   : > { %885 = vsyncadd (%p668_p2), %s499_s29, 4294967168  ;;  %s23_s20 = sadd.s32 1, %s908_s20   ;;  %s1133_s21 = sld [smem:[#allocation15_spill]] }
 0x2a2   : > { %p20_p3 = scmp.ge.s32.totalorder %s23_s20, 4   ;;  %s1134_s17 = sld [smem:[#allocation18_spill]] }
 0x2a3   : > { %s1135_s18 = sld [smem:[#allocation16_spill]]  ;;  %s1137_s15 = smov %s892_s16 }
 0x2a4   : > { %s1136_s19 = sld [smem:[#allocation17_spill]]  ;;  %22 = sbr.rel (!%p20_p3) target bundleno = 10 (0xa), region = 116 }
 0x2a7   : > { %s1138_s16 = smov %s1133_s21 }
 0x2a9   :  { %505 = vsyncpa [#allocation6], 1 }
 0x2aa   :  { %507 = vsyncpa [#allocation6 + $0x1], 1 }
 0x2ab   :  { %508 = vsyncpa [#allocation9], 1 }
 0x2ac   :  { %510 = vsyncpa [#allocation9 + $0x1], 1 }
 0x2ad   :  { %511 = vsyncpa [#allocation7], 1 }
 0x2ae   :  { %513 = vsyncpa [#allocation7 + $0x1], 1 }

</bundles_post_ra>
